<compile_context>
chip_gen: v7x
topology: tpu7x:2x2x1
jax: 0.10.0
libtpu: 0.0.40
codegen_flags: <defaults>
</compile_context>

<pallas_src>
import functools

import jax
import jax.numpy as jnp
from jax.experimental import pallas as pl
from jax.experimental.pallas import tpu as pltpu


def _project3d_kernel(p_ref, pts_ref, out_ref, *, eps: float):
    # p_ref  : (1, 8, 4)  VMEM. Rows 0..3 = K @ cam_T_world, rows 4..7 = 0.
    # pts_ref: (1, 4, TN) VMEM. Homogeneous points (x, y, z, w) x TN lanes.
    # out_ref: (1, 3, TN) VMEM. Rows: pixel x, pixel y, depth.
    #
    # One tiny MXU matmul produces all cam rows sublane-packed: (8,4)@(4,TN).
    # HIGHEST precision keeps the f32 contraction exact (module semantics).
    cam = jnp.dot(p_ref[0], pts_ref[0],
                  precision=jax.lax.Precision.HIGHEST,
                  preferred_element_type=jnp.float32)          # (8, TN)

    cam_z = cam[2:3, :]                                        # (1, TN)
    depth = cam_z + eps                                        # depth = z + eps

    # EUP approximate reciprocal + one Newton-Raphson refinement (~f32 exact),
    # instead of the multi-op f32 VALU divide.
    r = pl.reciprocal(depth, approx=True)
    r = r * (2.0 - depth * r)
    scale = jnp.where(jnp.abs(cam_z) > eps, r, 1.0)            # (1, TN)

    # Per-row lane-dense stores (no sublane concatenate).
    out_ref[0, 0:1, :] = cam[0:1, :] * scale
    out_ref[0, 1:2, :] = cam[1:2, :] * scale
    out_ref[0, 2:3, :] = depth


def project3d(points_b4N: jax.Array,
              K_b44: jax.Array,
              cam_T_world_b44: jax.Array,
              eps: float = 1e-8,
              tn: int | None = None) -> jax.Array:
    B, four, N = points_b4N.shape
    assert four == 4
    f32 = jnp.float32

    # Hoist the 4x4 @ 4x4 to XLA (exact f32) and pad the rows to a full
    # 8-sublane MXU lhs tile.  (B,8,4) is tiny; the per-batch block is reused
    # across all lane tiles of that batch.
    P_b44 = jnp.matmul(K_b44.astype(f32), cam_T_world_b44.astype(f32),
                       precision=jax.lax.Precision.HIGHEST)
    P_b84 = jnp.pad(P_b44, ((0, 0), (0, 4), (0, 0)))
    pts = points_b4N.astype(f32)

    if tn is None:
        TN_MAX = 8192                      # mem-bound: ~roofline well below this
        n_tiles = pl.cdiv(N, TN_MAX)       # number of lane tiles (>= 1)
        tn = ((pl.cdiv(N, n_tiles) + 127) // 128) * 128
    assert tn % 128 == 0

    # Last block may overhang N: Pallas masks the out-of-bounds loads/stores,
    # and all math is per-lane, so garbage tail lanes never leak.
    grid = (B, pl.cdiv(N, tn))

    out = pl.pallas_call(
        functools.partial(_project3d_kernel, eps=float(eps)),
        out_shape=jax.ShapeDtypeStruct((B, 3, N), f32),
        grid=grid,
        in_specs=[
            # Whole per-batch projection matrix (rows padded to 8).
            pl.BlockSpec((1, 8, 4), lambda b, j: (b, 0, 0)),
            # Points: one batch x all 4 rows x tn lanes per step.
            pl.BlockSpec((1, 4, tn), lambda b, j: (b, 0, j)),
        ],
        out_specs=pl.BlockSpec((1, 3, tn), lambda b, j: (b, 0, j)),
        compiler_params=pltpu.CompilerParams(
            dimension_semantics=("parallel", "parallel"),
        ),
        cost_estimate=pl.CostEstimate(
            flops=int((2 * 8 * 4 + 12) * B * N),
            transcendentals=int(B * N),
            # Real DMA traffic: 8-sublane-padded input and output tiles.
            bytes_accessed=int(64 * B * N),
        ),
    )(P_b84, pts)
    return out


def project3d_ref(points_b4N, K_b44, cam_T_world_b44, eps=1e-8):
    """Pure-JAX reference mirroring the PyTorch module (exact f32)."""
    P = jnp.matmul(K_b44, cam_T_world_b44, precision=jax.lax.Precision.HIGHEST)
    cam = jnp.einsum("bij,bjn->bin", P[:, :3], points_b4N,
                     precision=jax.lax.Precision.HIGHEST)
    z = cam[:, 2:]
    depth = z + eps
    scale = jnp.where(jnp.abs(z) > eps, 1.0 / depth, 1.0)
    return jnp.concatenate([cam[:, :2] * scale, depth], axis=1)


if __name__ == "__main__":
    key = jax.random.PRNGKey(0)
    B, N = 2, 256
    k1, k2 = jax.random.split(key, 2)

    # Homogeneous 3D points (last row = 1).
    xyz = jax.random.normal(k1, (B, 3, N), dtype=jnp.float32) * 2.0
    ones = jnp.ones((B, 1, N), dtype=jnp.float32)
    points_b4N = jnp.concatenate([xyz, ones], axis=1)

    # Simple deterministic pinhole intrinsics embedded in a 4x4 identity.
    K = jnp.eye(4, dtype=jnp.float32)
    K = K.at[0, 0].set(100.0).at[1, 1].set(100.0)
    K = K.at[0, 2].set(64.0).at[1, 2].set(64.0)
    K_b44 = jnp.broadcast_to(K, (B, 4, 4))

    # Extrinsics: identity rotation + small translation pushing points forward.
    t = jax.random.normal(k2, (B, 3), dtype=jnp.float32) * 0.1
    T = jnp.broadcast_to(jnp.eye(4, dtype=jnp.float32), (B, 4, 4))
    T = T.at[:, :3, 3].set(t + jnp.array([0.0, 0.0, 5.0], jnp.float32))
    cam_T_world_b44 = T

    # Exact-tile path.
    out = jax.block_until_ready(project3d(points_b4N, K_b44, cam_T_world_b44))
    ref = project3d_ref(points_b4N, K_b44, cam_T_world_b44)
    assert out.shape == (B, 3, N)
    assert jnp.allclose(out, ref, atol=1e-4, rtol=1e-4), "mismatch vs reference"

    # Masked-tail path: N not a multiple of the lane tile, multi-step grid,
    # last block overhangs (no wrapper pad / slice involved).
    N2 = 200
    pts2 = points_b4N[:, :, :N2]
    out2 = jax.block_until_ready(project3d(pts2, K_b44, cam_T_world_b44, tn=128))
    ref2 = project3d_ref(pts2, K_b44, cam_T_world_b44)
    assert out2.shape == (B, 3, N2)
    assert jnp.allclose(out2, ref2, atol=1e-4, rtol=1e-4), "mismatch (tail path)"

    print("KERNEL_OK")
</pallas_src>

<mosaic_0001>
module attributes {stable_mosaic.version = 11 : i64} {
  func.func @_project3d_kernel(%arg0: i32, %arg1: i32, %arg2: memref<1x8x4xf32, #tpu.memory_space<vmem>>, %arg3: memref<1x4x256xf32, #tpu.memory_space<vmem>>, %arg4: memref<1x3x256xf32, #tpu.memory_space<vmem>>) attributes {dimension_semantics = [#tpu.dimension_semantics<parallel>, #tpu.dimension_semantics<parallel>], iteration_bounds = array<i64: 2, 1>, scalar_prefetch = 0 : i64, scratch_operands = 0 : i64, tpu.core_type = #tpu.core_type<tc>, window_params = [{transform_indices = @transform_0, window_bounds = array<i64: 1, 8, 4>}, {transform_indices = @transform_1, window_bounds = array<i64: 1, 4, 256>}, {transform_indices = @transform_2, window_bounds = array<i64: 1, 3, 256>}]} {
    %c0 = arith.constant 0 : index
    %c0_0 = arith.constant 0 : index
    %c0_1 = arith.constant 0 : index
    %0 = vector.load %arg2[%c0, %c0_0, %c0_1] : memref<1x8x4xf32, #tpu.memory_space<vmem>>, vector<1x8x4xf32>
    %1 = vector.shape_cast %0 : vector<1x8x4xf32> to vector<8x4xf32>
    %c0_2 = arith.constant 0 : index
    %c0_3 = arith.constant 0 : index
    %c0_4 = arith.constant 0 : index
    %2 = vector.load %arg3[%c0_2, %c0_3, %c0_4] : memref<1x4x256xf32, #tpu.memory_space<vmem>>, vector<1x4x256xf32>
    %3 = vector.shape_cast %2 : vector<1x4x256xf32> to vector<4x256xf32>
    %cst = arith.constant dense<0.000000e+00> : vector<8x256xf32>
    %4 = tpu.matmul %1, %3, %cst {dimension_numbers = #tpu.dot_dimension_numbers<[1], [0], [0], [1], [0, 0, 1, 1], [], []>, precision = #tpu.contract_precision<fp32>} : vector<8x4xf32>, vector<4x256xf32>, vector<8x256xf32> -> vector<8x256xf32>
    %5 = vector.extract_strided_slice %4 {offsets = [2, 0], sizes = [1, 256], strides = [1, 1]} : vector<8x256xf32> to vector<1x256xf32>
    %cst_5 = arith.constant 9.99999993E-9 : f32
    %6 = vector.broadcast %cst_5 : f32 to vector<1x256xf32>
    %7 = arith.addf %5, %6 : vector<1x256xf32>
    %8 = tpu.reciprocal %7 {approx = true} : vector<1x256xf32> -> vector<1x256xf32>
    %9 = arith.mulf %7, %8 : vector<1x256xf32>
    %cst_6 = arith.constant 2.000000e+00 : f32
    %10 = vector.broadcast %cst_6 : f32 to vector<1x256xf32>
    %11 = arith.subf %10, %9 : vector<1x256xf32>
    %12 = arith.mulf %8, %11 : vector<1x256xf32>
    %13 = math.absf %5 : vector<1x256xf32>
    %cst_7 = arith.constant 9.99999993E-9 : f32
    %14 = vector.broadcast %cst_7 : f32 to vector<1x256xf32>
    %15 = arith.cmpf ogt, %13, %14 : vector<1x256xf32>
    %cst_8 = arith.constant 1.000000e+00 : f32
    %16 = vector.broadcast %cst_8 : f32 to vector<1x256xf32>
    %17 = arith.select %15, %12, %16 : vector<1x256xi1>, vector<1x256xf32>
    %18 = vector.extract_strided_slice %4 {offsets = [0, 0], sizes = [1, 256], strides = [1, 1]} : vector<8x256xf32> to vector<1x256xf32>
    %19 = arith.mulf %18, %17 : vector<1x256xf32>
    %c0_9 = arith.constant 0 : index
    %c0_10 = arith.constant 0 : index
    %c0_11 = arith.constant 0 : index
    %20 = vector.load %arg4[%c0_9, %c0_10, %c0_11] : memref<1x3x256xf32, #tpu.memory_space<vmem>>, vector<1x1x256xf32>
    %21 = vector.shape_cast %20 : vector<1x1x256xf32> to vector<1x256xf32>
    %22 = vector.shape_cast %19 : vector<1x256xf32> to vector<1x1x256xf32>
    tpu.vector_store %arg4[%c0_9, %c0_10, %c0_11], %22 {strides = array<i32>} : memref<1x3x256xf32, #tpu.memory_space<vmem>>, vector<1x1x256xf32>,
    %23 = vector.extract_strided_slice %4 {offsets = [1, 0], sizes = [1, 256], strides = [1, 1]} : vector<8x256xf32> to vector<1x256xf32>
    %24 = arith.mulf %23, %17 : vector<1x256xf32>
    %c0_12 = arith.constant 0 : index
    %c1 = arith.constant 1 : index
    %c0_13 = arith.constant 0 : index
    %25 = vector.load %arg4[%c0_12, %c1, %c0_13] : memref<1x3x256xf32, #tpu.memory_space<vmem>>, vector<1x1x256xf32>
    %26 = vector.shape_cast %25 : vector<1x1x256xf32> to vector<1x256xf32>
    %27 = vector.shape_cast %24 : vector<1x256xf32> to vector<1x1x256xf32>
    tpu.vector_store %arg4[%c0_12, %c1, %c0_13], %27 {strides = array<i32>} : memref<1x3x256xf32, #tpu.memory_space<vmem>>, vector<1x1x256xf32>,
    %c0_14 = arith.constant 0 : index
    %c2 = arith.constant 2 : index
    %c0_15 = arith.constant 0 : index
    %28 = vector.load %arg4[%c0_14, %c2, %c0_15] : memref<1x3x256xf32, #tpu.memory_space<vmem>>, vector<1x1x256xf32>
    %29 = vector.shape_cast %28 : vector<1x1x256xf32> to vector<1x256xf32>
    %30 = vector.shape_cast %7 : vector<1x256xf32> to vector<1x1x256xf32>
    tpu.vector_store %arg4[%c0_14, %c2, %c0_15], %30 {strides = array<i32>} : memref<1x3x256xf32, #tpu.memory_space<vmem>>, vector<1x1x256xf32>,
    return
  }
  func.func @transform_0(%arg0: i32, %arg1: i32) -> (i32, i32, i32) {
    %c0_i32 = arith.constant 0 : i32
    %c0_i32_0 = arith.constant 0 : i32
    %c0_i32_1 = arith.constant 0 : i32
    return %arg0, %c0_i32, %c0_i32_0 : i32, i32, i32
  }
  func.func @transform_1(%arg0: i32, %arg1: i32) -> (i32, i32, i32) {
    %c0_i32 = arith.constant 0 : i32
    %c0_i32_0 = arith.constant 0 : i32
    return %arg0, %c0_i32, %arg1 : i32, i32, i32
  }
  func.func @transform_2(%arg0: i32, %arg1: i32) -> (i32, i32, i32) {
    %c0_i32 = arith.constant 0 : i32
    %c0_i32_0 = arith.constant 0 : i32
    return %arg0, %c0_i32, %arg1 : i32, i32, i32
  }
}

</mosaic_0001>

<bundles_post_ra>
// kernel: tpu_custom_call.1
= control target key start
LH: loop header
LB: loop body
LE: loop exit
PB: predicated region body
PF: predicated region fallthrough
CT: control target
= control target key end

     0   :  { %s970_s9 = smov 0   ;;  %s972_s10 = smov 0   ;;  %s1026_s0 = inlined_call_operand.vmem [shape: f32[2,8,4], index: 0, kind: input, shape index: {}]   ;;  %s1027_s1 = inlined_call_operand.vmem [shape: f32[2,4,256], index: 1, kind: input, shape index: {}]   ;;  %s1028_s2 = inlined_call_operand.vmem [shape: f32[2,3,256], index: 2, kind: output, shape index: {}]  }
   0x1   :  { %s974_s11 = smov 0  }
   0x2 LB: > { %s24_s12 = sadd.s32 1, %s947_s10  ;;  %p876_p0 = scmp.ge.s32.totalorder %s951_s11, 1  ;;  %s951_s11 = sphi %s974_s11, %s12_s11   ;;  %s947_s10 = sphi %s972_s10, %s1032_s10   ;;  %s943_s9 = sphi %s970_s9, %s1031_s9  }
   0x3   : > { %p26_p1 = scmp.ge.s32.totalorder %s24_s12, 2  ;;  %p142_p2 = scmp.lt.s32.totalorder %s951_s11, 3 }
   0x5   : > { %s1034_s12 = smov (%p26_p1, %s24_s12), 0  ;;  %p143_p3 = pnand %p876_p0, %p142_p2 }
   0x6   : > { %p176_p4 = scmp.lt.s32.totalorder (!%p143_p3), %s943_s9, 1  ;;  %v953_v0 = vmov (!%p143_p3), 0.0   ;;  %vm208_vm0 = vcmask (!%p143_p3), 1043456   ;;  %vm204_vm1 = vcmask (!%p143_p3), 31744   ;;  %v954_v23 = vmov (!%p143_p3), 1966171168  }
   0x7   : > { %146 = sbr.rel (%p143_p3) target bundleno = 294 (0x126), region = 28  ;;  %516 = vmatprep.mubr.f32.mxu0 (!%p143_p3), %v953_v0  ;;  %279 = vmatprep.mubr.f32.mxu1 (!%p143_p3), %v953_v0  ;;  %v706_v24 = vunpack.c.l.s4 (!%p143_p3), %v954_v23  ;;  %v708_v25 = vlaneseq (!%p143_p3) }
   0x9   : > { %v707_v28 = vunpack.c.0.s8 (!%p143_p3), %v706_v24  ;;  %v709_v29 = vshrl.u32 (!%p143_p3), %v708_v25, 7  ;;  %vm1004_vm2 = vcmp.lt.s32.totalorder (!%p143_p3), %v708_v25, 256 }
   0xb   : > { %v710_v35 = vsub.s32 (!%p143_p3), %v707_v28, %v709_v29 }
   0xe   : > { %s1036_s9 = smov (!%p176_p4, %s943_s9), 1 }
   0xf   : > { %s988_s13 = sshll.u32 %s1036_s9, 3 }
  0x10   : > { %s188_s16 = scalar_lea.vmem %s1027_s1, %s988_s13  ;;  %s179_s19 = scalar_lea.vmem %s1026_s0, %s988_s13 }
  0x11   : > { %v201_v1 = vld [vmem:[%s188_s16] sm:$0xff]  ;;  %s1002_s22 = scalar_lea.vmem %s1028_s2, %s988_s13 }
  0x12   : > { %v203_v2 = vcombine.high %v201_v1, %v201_v1  ;;  %v209_v3 = vsel %vm208_vm0, %v201_v1, 0  ;;  %v200_v4 = vld [vmem:[%s179_s19] sm:$0xff] }
  0x13   : > { %v215_v5 = vand.u32 4294901760, %v209_v3  ;;  %v206_v6 = vsel %vm204_vm1, %v200_v4, 0 }
  0x14   : > { %v211_v7 = vsel %vm208_vm0, %v203_v2, 0  ;;  %v280_v8 = vand.u32 4294901760, %v206_v6 }
  0x15   : > { %v213_v9 = vand.u32 4294901760, %v211_v7  ;;  %v298_v10 = vsub.f32 %v209_v3, %v215_v5 }
  0x16   : > { %v281_v11 = vsub.f32 %v206_v6, %v280_v8 }
  0x17   : > { %451 = vmatprep.subr.mxu0 %v213_v9  ;;  %214 = vmatprep.subr.mxu1 %v213_v9  ;;  %v292_v12 = vsub.f32 %v211_v7, %v213_v9  ;;  %v299_v13 = vand.u32 4294901760, %v298_v10 }
  0x18   : > { %453 = vmatpush1.msra.mxu0 %v215_v5  ;;  %v282_v14 = vand.u32 4294901760, %v281_v11  ;;  %216 = vmatpush1.msra.mxu1 %v215_v5 }
  0x19   : > { %v293_v15 = vand.u32 4294901760, %v292_v12  ;;  %v300_v16 = vsub.f32 %v298_v10, %v299_v13 }
  0x1a   : > { %520 = vmatmul.mubr.f32.vlgmr.msra.gmra.mrb[0].mxu0 %v282_v14  ;;  %v283_v17 = vsub.f32 %v281_v11, %v282_v14 }
  0x1b   : > { %v294_v18 = vsub.f32 %v292_v12, %v293_v15  ;;  %529 = vmatprep.subr.mxu0 %v293_v15  ;;  %596 = vmatprep.mubr.f32.mxu0 %v953_v0  ;;  %v301_v20 = vand.u32 4294901760, %v300_v16 }
  0x1c   : > { %v284_v19 = vand.u32 4294901760, %v283_v17  ;;  %533 = vmatpush1.msra.mxu0 %v299_v13 }
  0x1d   : > { %v295_v21 = vand.u32 4294901760, %v294_v18  ;;  %605 = vmatprep.subr.mxu0 %v213_v9 }
  0x1e   : > { %285 = vmatmul.mubr.f32.vlgmr.msra.gmra.mrb[0].mxu1 %v284_v19 }
  0x1f   : > { %296 = vmatprep.subr.mxu1 %v295_v21  ;;  %365 = vmatprep.mubr.f32.mxu1 %v953_v0 }
  0x20   : > { %302 = vmatpush1.msra.mxu1 %v301_v20 }
  0x21   : > { %375 = vmatprep.subr.mxu1 %v292_v12 }
  0x22   : > { %598 = vmatmul.mubr.f32.vlgmr.msra.gmra.mrb[0].mxu0 %v280_v8 }
  0x23   : > { %607 = vmatpush1.msra.mxu0 %v215_v5  ;;  %670 = vmatprep.mubr.f32.mxu0 %v953_v0 }
  0x26   : > { %367 = vmatmul.mubr.f32.vlgmr.msra.gmra.mrb[0].mxu1 %v280_v8 }
  0x27   : > { %378 = vmatpush1.msra.mxu1 %v298_v10  ;;  %441 = vmatprep.mubr.f32.mxu1 %v953_v0 }
  0x2a   : > { %672 = vmatmul.mubr.f32.vlgmr.msra.gmra.mrb[0].mxu0 %v280_v8 }
  0x2e   : > { %444 = vmatmul.mubr.f32.vlgmr.msra.gmra.mrb[0].mxu1 %v281_v11 }
  0xfd   : > { %v673_v22 = vpop.f32.mrb[0].mxu0 }
  0xfe   : > { %v675_v26 = vpop.f32.mrb[1].mxu0 }
 0x101   : > { %v445_v27 = vpop.f32.mrb[0].mxu1 }
 0x102   : > { %v888_v30 = vadd.f32 %v673_v22, %v445_v27  ;;  %v447_v31 = vpop.f32.mrb[1].mxu1 }
 0x103   : > { %v889_v32 = vadd.f32 %v675_v26, %v447_v31 }
 0x104   : > { %v678_v33 = vadd.f32 1e-08, %v888_v30  ;;  %v688_v44 = vand.u32 2147483647, %v888_v30 }
 0x105   : > { %v679_v34 = vadd.f32 1e-08, %v889_v32  ;;  %v689_v47 = vand.u32 2147483647, %v889_v32 }
 0x106   : > { %925 = vrcp.f32 %v678_v33  ;;  %vm690_vm3 = vcmp.gt.f32.partialorder %v688_v44, 1e-08 }
 0x107   : > { %927 = vrcp.f32 %v679_v34  ;;  %v754_v36 = vcombine.low %v678_v33, %v679_v34  ;;  %vm691_vm4 = vcmp.gt.f32.partialorder %v689_v47, 1e-08 }
 0x109   : > { %v761_v37 = vrot.slane %v754_v36, %v710_v35 }
 0x10b   : > { %v768_v38 = vrot.slane %v761_v37, %v710_v35 }
 0x10d   : > { %v769_v40 = vcombine.high %v768_v38, %v768_v38 }
 0x10f   : > { %883 = vst.msk [vmem:[%s1002_s22 + $0x2] ss:$4 sm:$0x3] %vm1004_vm2, %v769_v40 }
 0x110   : > { %v926_v41 = vpop.eup %925 }
 0x111   : > { %v928_v42 = vpop.eup %927  ;;  %v682_v43 = vmul.f32 %v926_v41, %v678_v33 }
 0x112   : > { %v683_v45 = vmul.f32 %v928_v42, %v679_v34 }
 0x113   : > { %v684_v46 = vsub.f32 2.0, %v682_v43 }
 0x114   : > { %v685_v48 = vsub.f32 2.0, %v683_v45 }
 0x115   : > { %v686_v49 = vmul.f32 %v926_v41, %v684_v46 }
 0x116   : > { %v687_v50 = vmul.f32 %v928_v42, %v685_v48 }
 0x117   : > { %v692_v51 = vsel %vm690_vm3, %v686_v49, 1.0 }
 0x118   : > { %v696_v52 = vrot.slane %v692_v51, 2  ;;  %v725_v53 = vrot.slane %v692_v51, 1  ;;  %v693_v54 = vsel %vm691_vm4, %v687_v50, 1.0 }
 0x119   : > { %v697_v55 = vrot.slane %v693_v54, 2  ;;  %v726_v56 = vrot.slane %v693_v54, 1 }
 0x11a   : > { %v700_v57 = vmul.f32 %v888_v30, %v696_v52  ;;  %v729_v58 = vmul.f32 %v888_v30, %v725_v53 }
 0x11b   : > { %v701_v59 = vmul.f32 %v889_v32, %v697_v55  ;;  %v730_v60 = vmul.f32 %v889_v32, %v726_v56 }
 0x11d   : > { %v704_v61 = vcombine.low %v700_v57, %v701_v59  ;;  %v733_v62 = vcombine.low %v729_v58, %v730_v60 }
 0x11f   : > { %v711_v63 = vrot.slane %v704_v61, %v710_v35  ;;  %v740_v0 = vrot.slane %v733_v62, %v710_v35 }
 0x121   : > { %v718_v1 = vrot.slane %v711_v63, %v710_v35  ;;  %v741_v2 = vcombine.high %v740_v0, %v740_v0 }
 0x123   : > { %724 = vst.msk [vmem:[%s1002_s22] ss:$4 sm:$0x3] %vm1004_vm2, %v718_v1  ;;  %v748_v3 = vrot.slane %v741_v2, %v710_v35 }
 0x125   : > { %882 = vst.msk [vmem:[%s1002_s22 + $0x1] ss:$4 sm:$0x3] %vm1004_vm2, %v748_v3 }
 0x126 PF: > { %s12_s11 = sadd.s32 1, %s951_s11   ;;  %s1031_s9 = smov %s947_s10 }
 0x127   : > { %p9_p5 = scmp.ge.s32.totalorder %s12_s11, 4   ;;  %s1032_s10 = smov %s1034_s12 }
 0x129   :  { %11 = sbr.rel (!%p9_p5) target bundleno = 2 (0x2), region = 63 }

</bundles_post_ra>
